<compile_context>
chip_gen: v7x
topology: tpu7x:2x2x1
jax: 0.10.0
libtpu: 0.0.40
codegen_flags: <defaults>
</compile_context>

<pallas_src>
import jax
import jax.numpy as jnp
from jax.experimental import pallas as pl
from jax.experimental.pallas import tpu as pltpu

LANE = 1024                    # lane-dense last dim for flattened inputs
TARGET_TILE_BYTES = 4 << 20    # ~4 MiB per block buffer (tm=1024 rows for f32)
VMEM_LIMIT_BYTES = 40 << 20    # headroom for double-buffered in+out tiles


def basicnn_kernel(params_ref, x_ref, o_ref):
    # params_ref: SMEM (7,) f32 -> [w00, b00, w01, w10, b10, w11, finalbias]
    w00 = params_ref[0]
    b00 = params_ref[1]
    w01 = params_ref[2]
    w10 = params_ref[3]
    b10 = params_ref[4]
    w11 = params_ref[5]
    finalbias = params_ref[6]

    x = x_ref[...].astype(jnp.float32)
    top = jnp.maximum(x * w00 + b00, 0.0) * w01
    bot = jnp.maximum(x * w10 + b10, 0.0) * w11
    o_ref[...] = jnp.maximum(top + bot + finalbias, 0.0).astype(o_ref.dtype)


def _sublane_multiple(dtype):
    # Rows per vreg: f32 -> 8, bf16 -> 16, int8/fp8 -> 32.
    return max(8, 32 // jnp.dtype(dtype).itemsize)


def _forward_2d(x2d, params):
    """Run the kernel over a (R, D) slab (D lane-friendly), tiled along rows."""
    R, D = x2d.shape
    itemsize = jnp.dtype(x2d.dtype).itemsize
    sub = _sublane_multiple(x2d.dtype)

    # Row tile: ~TARGET_TILE_BYTES per buffer, rounded to the sublane packing.
    tm_target = max(sub, (TARGET_TILE_BYTES // (D * itemsize)) // sub * sub)
    if R <= tm_target:
        tm = R            # one block covering all rows (full-dim block is legal)
    else:
        tm = tm_target    # multiple blocks; partial final block is masked
    grid = (pl.cdiv(R, tm),)

    flops = 11 * R * D                     # 11 elementwise ops per element
    bytes_accessed = 2 * R * D * itemsize  # one read + one write pass

    return pl.pallas_call(
        basicnn_kernel,
        out_shape=jax.ShapeDtypeStruct((R, D), x2d.dtype),
        grid_spec=pltpu.PrefetchScalarGridSpec(
            num_scalar_prefetch=0,
            grid=grid,
            in_specs=[
                pl.BlockSpec(memory_space=pltpu.MemorySpace.SMEM),  # params
                pl.BlockSpec((tm, D), lambda i: (i, 0)),            # x tile
            ],
            out_specs=pl.BlockSpec((tm, D), lambda i: (i, 0)),
        ),
        compiler_params=pltpu.CompilerParams(
            dimension_semantics=("parallel",),   # independent tiles -> megacore
            vmem_limit_bytes=VMEM_LIMIT_BYTES,
        ),
        cost_estimate=pl.CostEstimate(
            flops=flops, transcendentals=0, bytes_accessed=bytes_accessed),
    )(params, x2d)


def _jnp_forward(x, params):
    """Pure-jnp reference (also used for tiny ragged tails)."""
    w00, b00, w01, w10, b10, w11, fb = [params[i] for i in range(7)]
    xf = x.astype(jnp.float32)
    top = jnp.maximum(xf * w00 + b00, 0.0) * w01
    bot = jnp.maximum(xf * w10 + b10, 0.0) * w11
    return jnp.maximum(top + bot + fb, 0.0).astype(x.dtype)


def basicnn_forward(x, params):
    """Elementwise BasicNN forward for arbitrarily-shaped x (f32 or bf16)."""
    orig_shape = x.shape
    total = x.size

    # (1) LANE-aligned element count: zero-copy reshape to a lane-dense slab.
    if total > 0 and total % LANE == 0:
        x2d = x.reshape(total // LANE, LANE)
        return _forward_2d(x2d, params).reshape(orig_shape)

    # (2) Last dim already a multiple of 128: zero-copy 2D collapse
    #     (stores remain unmasked full-lane vst).
    if x.ndim >= 2 and x.shape[-1] % 128 == 0 and total > 0:
        D = x.shape[-1]
        x2d = x.reshape(total // D, D)
        return _forward_2d(x2d, params).reshape(orig_shape)

    # (3) Ragged: kernel on the LANE-aligned prefix, tiny (<LANE) tail in jnp.
    flat = x.reshape(-1)
    main = (total // LANE) * LANE
    if main == 0:
        return _jnp_forward(x, params)
    main_out = _forward_2d(flat[:main].reshape(main // LANE, LANE),
                           params).reshape(-1)
    tail_out = _jnp_forward(flat[main:], params)
    return jnp.concatenate([main_out, tail_out]).reshape(orig_shape)


if __name__ == "__main__":
    # Deterministic parameters (from the module __init__), finalbias = 0.0.
    params = jnp.array([1.7, -0.85, -40.8, 12.6, 0.0, 2.7, 0.0],
                       dtype=jnp.float32)
    fwd = jax.jit(basicnn_forward)

    key = jax.random.PRNGKey(0)
    k1, k2, k3, k4 = jax.random.split(key, 4)

    # 1) Small module-consistent shape (2, 4, 16, 16): LANE-aligned zero-copy path.
    x = jax.random.uniform(k1, (2, 4, 16, 16), dtype=jnp.float32)
    out = jax.block_until_ready(fwd(x, params))
    assert out.shape == x.shape and out.dtype == x.dtype
    assert jnp.allclose(out, _jnp_forward(x, params), atol=1e-5, rtol=1e-5)

    # 2) Row count not a multiple of the tile -> masked edge block, no padding.
    x2 = jax.random.uniform(k2, (1100, 1024), dtype=jnp.float32)
    out2 = jax.block_until_ready(fwd(x2, params))
    assert jnp.allclose(out2, _jnp_forward(x2, params), atol=1e-5, rtol=1e-5)

    # 3) Ragged shape (not LANE-aligned) -> kernel prefix + tiny jnp tail.
    x3 = jax.random.uniform(k3, (5, 300), dtype=jnp.float32)
    out3 = jax.block_until_ready(fwd(x3, params))
    assert jnp.allclose(out3, _jnp_forward(x3, params), atol=1e-5, rtol=1e-5)

    # 4) bf16 I/O (f32 compute inside the kernel, bf16 store).
    x4 = jax.random.uniform(k4, (64, 256), dtype=jnp.float32).astype(jnp.bfloat16)
    out4 = jax.block_until_ready(fwd(x4, params))
    ref4 = _jnp_forward(x4, params)
    assert out4.dtype == jnp.bfloat16
    assert jnp.allclose(out4.astype(jnp.float32), ref4.astype(jnp.float32),
                        atol=1e-2, rtol=1e-2)

    print("KERNEL_OK")
</pallas_src>

<mosaic_0001>
module attributes {stable_mosaic.version = 11 : i64} {
  func.func @basicnn_kernel(%arg0: i32, %arg1: memref<7xf32, #tpu.memory_space<smem>>, %arg2: memref<2x1024xf32, #tpu.memory_space<vmem>>, %arg3: memref<2x1024xf32, #tpu.memory_space<vmem>>) attributes {dimension_semantics = [#tpu.dimension_semantics<parallel>], iteration_bounds = array<i64: 1>, scalar_prefetch = 0 : i64, scratch_operands = 0 : i64, tpu.core_type = #tpu.core_type<tc>, window_params = [{transform_indices = @transform_0, window_bounds = array<i64: 7>}, {transform_indices = @transform_1, window_bounds = array<i64: 2, 1024>}, {transform_indices = @transform_2, window_bounds = array<i64: 2, 1024>}]} {
    %c0 = arith.constant 0 : index
    %0 = memref.load %arg1[%c0] : memref<7xf32, #tpu.memory_space<smem>>
    %c1 = arith.constant 1 : index
    %1 = memref.load %arg1[%c1] : memref<7xf32, #tpu.memory_space<smem>>
    %c2 = arith.constant 2 : index
    %2 = memref.load %arg1[%c2] : memref<7xf32, #tpu.memory_space<smem>>
    %c3 = arith.constant 3 : index
    %3 = memref.load %arg1[%c3] : memref<7xf32, #tpu.memory_space<smem>>
    %c4 = arith.constant 4 : index
    %4 = memref.load %arg1[%c4] : memref<7xf32, #tpu.memory_space<smem>>
    %c5 = arith.constant 5 : index
    %5 = memref.load %arg1[%c5] : memref<7xf32, #tpu.memory_space<smem>>
    %c6 = arith.constant 6 : index
    %6 = memref.load %arg1[%c6] : memref<7xf32, #tpu.memory_space<smem>>
    %c0_0 = arith.constant 0 : index
    %c0_1 = arith.constant 0 : index
    %7 = vector.load %arg2[%c0_0, %c0_1] : memref<2x1024xf32, #tpu.memory_space<vmem>>, vector<2x1024xf32>
    %8 = vector.broadcast %0 : f32 to vector<2x1024xf32>
    %9 = arith.mulf %7, %8 : vector<2x1024xf32>
    %10 = vector.broadcast %1 : f32 to vector<2x1024xf32>
    %11 = arith.addf %9, %10 : vector<2x1024xf32>
    %cst = arith.constant 0.000000e+00 : f32
    %12 = vector.broadcast %cst : f32 to vector<2x1024xf32>
    %13 = arith.maximumf %11, %12 : vector<2x1024xf32>
    %14 = vector.broadcast %2 : f32 to vector<2x1024xf32>
    %15 = arith.mulf %13, %14 : vector<2x1024xf32>
    %16 = vector.broadcast %3 : f32 to vector<2x1024xf32>
    %17 = arith.mulf %7, %16 : vector<2x1024xf32>
    %18 = vector.broadcast %4 : f32 to vector<2x1024xf32>
    %19 = arith.addf %17, %18 : vector<2x1024xf32>
    %cst_2 = arith.constant 0.000000e+00 : f32
    %20 = vector.broadcast %cst_2 : f32 to vector<2x1024xf32>
    %21 = arith.maximumf %19, %20 : vector<2x1024xf32>
    %22 = vector.broadcast %5 : f32 to vector<2x1024xf32>
    %23 = arith.mulf %21, %22 : vector<2x1024xf32>
    %24 = arith.addf %15, %23 : vector<2x1024xf32>
    %25 = vector.broadcast %6 : f32 to vector<2x1024xf32>
    %26 = arith.addf %24, %25 : vector<2x1024xf32>
    %cst_3 = arith.constant 0.000000e+00 : f32
    %27 = vector.broadcast %cst_3 : f32 to vector<2x1024xf32>
    %28 = arith.maximumf %26, %27 : vector<2x1024xf32>
    %c0_4 = arith.constant 0 : index
    %c0_5 = arith.constant 0 : index
    %29 = vector.load %arg3[%c0_4, %c0_5] : memref<2x1024xf32, #tpu.memory_space<vmem>>, vector<2x1024xf32>
    tpu.vector_store %arg3[%c0_4, %c0_5], %28 {strides = array<i32>} : memref<2x1024xf32, #tpu.memory_space<vmem>>, vector<2x1024xf32>,
    return
  }
  func.func @transform_0(%arg0: i32) -> i32 {
    %c0_i32 = arith.constant 0 : i32
    %c0_i32_0 = arith.constant 0 : i32
    return %c0_i32 : i32
  }
  func.func @transform_1(%arg0: i32) -> (i32, i32) {
    %c0_i32 = arith.constant 0 : i32
    %c0_i32_0 = arith.constant 0 : i32
    return %arg0, %c0_i32 : i32, i32
  }
  func.func @transform_2(%arg0: i32) -> (i32, i32) {
    %c0_i32 = arith.constant 0 : i32
    %c0_i32_0 = arith.constant 0 : i32
    return %arg0, %c0_i32 : i32, i32
  }
}

</mosaic_0001>

<bundles_post_ra>
// kernel: basicnn_forward.1
= control target key start
LH: loop header
LB: loop body
LE: loop exit
PB: predicated region body
PF: predicated region fallthrough
CT: control target
= control target key end

     0   :  { %7 = vsyncpa [#allocation3], 0  ;;  %s121_s0 = inlined_call_operand.vmem [shape: f32[7], index: 0, kind: input, shape index: {}]   ;;  %s122_s1 = inlined_call_operand.vmem [shape: f32[2,1024], index: 1, kind: input, shape index: {}]   ;;  %s123_s2 = inlined_call_operand.vmem [shape: f32[2,1024], index: 2, kind: output, shape index: {}]  }
   0x1   :  { %s14_s11 = sshll.u32 %s121_s0, 4  ;;  %s15_s11 = int_to_ptr.vmem [resolvable:$true] %s14_s11 }
   0x2   :  { %s76_s12 = scalar_lea.vmem %s15_s11, 16  ;;  %p81_p1 = scmp.lt.s32.totalorder %s15_s11, %s15_s11 }
   0x3   :  { %p77_p0 = scmp.ne.s32.totalorder %s15_s11, %s76_s12  ;;  %p82_p2 = scmp.lt.s32.totalorder %s76_s12, %s76_s12 }
   0x5   :  { %p83_p3 = por %p82_p2, %p81_p1 }
   0x7   :  { %p84_p4 = pnand %p83_p3, %p77_p0 }
   0x9   :  { %87 = shalt.err (!%p84_p4)
}
   0xa   :  { %s90_s13 = smov [#allocation2]  }
   0xb   :  { %17 = dma.vmem_to_smem %s15_s11, 16, %s90_s13, [#allocation3]  }
   0xc   :  { %88 = dma.done.wait [#allocation3], 16  }
   0xd   :  { %89 = vsyncadd [#allocation3], 4294967280 }
   0xe   :  { %23 = sfence }
   0xf   :  { %s24_s14 = sld [smem:[#allocation2]]  ;;  %s69_s15 = sld [smem:[#allocation2 + $0x1]]  ;;  %v31_v0 = vld [vmem:[%s122_s1] sm:$0xff]  ;;  %v32_v1 = vld [vmem:[%s122_s1 + $0x8] sm:$0xff] }
  0x10   :  { %s71_s16 = sld [smem:[#allocation2 + $0x3]]  ;;  %s70_s17 = sld [smem:[#allocation2 + $0x2]] }
  0x11   :  { %s72_s18 = sld [smem:[#allocation2 + $0x4]]  ;;  %s73_s19 = sld [smem:[#allocation2 + $0x5]] }
  0x12   :  { %s74_s23 = sld [smem:[#allocation2 + $0x6]] }
  0x15   :  { %v33_v2 = vstv %s24_s14  ;;  %v36_v3 = vstv %s69_s15 }
  0x16   :  { %v34_v4 = vmul.f32 %v33_v2, %v31_v0  ;;  %v44_v5 = vstv %s71_s16  ;;  %v35_v6 = vmul.f32 %v33_v2, %v32_v1  ;;  %v41_v12 = vstv %s70_s17 }
  0x17   :  { %v45_v7 = vmul.f32 %v44_v5, %v31_v0  ;;  %v47_v8 = vstv %s72_s18  ;;  %v46_v9 = vmul.f32 %v44_v5, %v32_v1  ;;  %v52_v16 = vstv %s73_s19 }
  0x18   :  { %v37_v10 = vadd.f32 %v36_v3, %v34_v4  ;;  %v38_v11 = vadd.f32 %v36_v3, %v35_v6  ;;  %v57_v24 = vstv %s74_s23 }
  0x19   :  { %v48_v13 = vadd.f32 %v47_v8, %v45_v7  ;;  %v49_v14 = vadd.f32 %v47_v8, %v46_v9 }
  0x1a   :  { %v39_v15 = vmax.f32 %v37_v10, 0.0  ;;  %v40_v17 = vmax.f32 %v38_v11, 0.0 }
  0x1b   :  { %v50_v18 = vmax.f32 %v48_v13, 0.0  ;;  %v51_v19 = vmax.f32 %v49_v14, 0.0 }
  0x1c   :  { %v42_v20 = vmul.f32 %v41_v12, %v39_v15  ;;  %v43_v21 = vmul.f32 %v41_v12, %v40_v17 }
  0x1d   :  { %v53_v22 = vmul.f32 %v52_v16, %v50_v18  ;;  %v54_v23 = vmul.f32 %v52_v16, %v51_v19 }
  0x1f   :  { %v55_v25 = vadd.f32 %v53_v22, %v42_v20  ;;  %v56_v26 = vadd.f32 %v54_v23, %v43_v21 }
  0x21   :  { %v58_v27 = vadd.f32 %v57_v24, %v55_v25  ;;  %v59_v28 = vadd.f32 %v57_v24, %v56_v26 }
  0x23   :  { %v60_v29 = vmax.f32 %v58_v27, 0.0  ;;  %v61_v30 = vmax.f32 %v59_v28, 0.0 }
  0x25   :  { %62 = vst [vmem:[%s123_s2] sm:$0xff] %v60_v29  ;;  %63 = vst [vmem:[%s123_s2 + $0x8] sm:$0xff] %v61_v30 }
  0x26   :  { %68 = vsyncpa [#allocation3], 1 }

</bundles_post_ra>
